<compile_context>
chip_gen: v7x
topology: tpu7x:2x2x1
jax: 0.10.0
libtpu: 0.0.40
codegen_flags: <defaults>
</compile_context>

<pallas_src>
import functools
import math

import numpy as np
import jax
import jax.numpy as jnp
from jax.experimental import pallas as pl
from jax.experimental.pallas import tpu as pltpu

LANE = 128


def _prefix_mean_matrix(batch, seq):
    """Block-diagonal prefix-mean matrix == softmax(causally-masked zeros).

    P[b*T+t, b*T+s] = [same batch and s <= t] * 1/(t+1).  Built with numpy so
    it is a literal constant at trace time (B, T are static shapes).
    """
    t = np.arange(seq, dtype=np.float32)
    blk = np.tril(np.ones((seq, seq), np.float32)) / (t + 1.0)[:, None]
    return np.kron(np.eye(batch, dtype=np.float32), blk).astype(np.float32)


def bow_block_kernel(p_ref, x_ref, wfc_ref, wpb_ref, o_ref, *, hidden):
    # p_ref:   (BT, BT)   constant prefix-mean matrix
    # x_ref:   (BT, Cp)   activations, lane-padded to 128
    # wfc_ref: (Cp, H)    c_fc weight, pre-transposed (in, out), rows padded
    # wpb_ref: (H+2, Cp)  rows 0..H-1 = c_proj weight, row H = bfc, row H+1 = bproj
    x = x_ref[...]                                            # (BT, Cp)

    # ---- CausalBoW: prefix mean via tiny constant matmul, first residual ----
    y = jnp.dot(p_ref[...], x, preferred_element_type=jnp.float32)
    x1 = x + y

    # ---- MLP: c_proj(tanh(c_fc(x1))), second residual ----
    wproj = wpb_ref[0:hidden, :]                              # (H, Cp)
    bfc = wpb_ref[hidden:hidden + 1, 0:hidden]                # (1, H)
    bproj = wpb_ref[hidden + 1:hidden + 2, :]                 # (1, Cp)

    h = jnp.tanh(
        jnp.dot(x1, wfc_ref[...], preferred_element_type=jnp.float32) + bfc
    )                                                         # (BT, H)
    m = jnp.dot(h, wproj, preferred_element_type=jnp.float32) + bproj

    o_ref[...] = x1 + m                                       # full-lane vst


def prepare_params(wfc_t, bfc, wproj_t, bproj):
    """One-time padding/packing of module parameters to the kernel layout.

    Call once per module (not per forward); reuse the outputs across calls.
    Returns (wfc_p (Cp, H), wpb (H+2, Cp)).
    """
    C, H = wfc_t.shape
    Cp = -(-C // LANE) * LANE
    assert H <= Cp, "packed-bias layout assumes hidden dim <= padded channel dim"

    wfc_p = jnp.pad(wfc_t.astype(jnp.float32), ((0, Cp - C), (0, 0)))        # (Cp, H)
    wproj_p = jnp.pad(wproj_t.astype(jnp.float32), ((0, 0), (0, Cp - C)))    # (H, Cp)
    bfc_row = jnp.pad(bfc.reshape(1, H).astype(jnp.float32),
                      ((0, 0), (0, Cp - H)))                                 # (1, Cp)
    bproj_row = jnp.pad(bproj.reshape(1, C).astype(jnp.float32),
                        ((0, 0), (0, Cp - C)))                               # (1, Cp)
    wpb = jnp.concatenate([wproj_p, bfc_row, bproj_row], axis=0)             # (H+2, Cp)
    return wfc_p, wpb


@jax.jit
def bow_block(x, wfc_p, wpb):
    B, T, C = x.shape
    Cp, H = wfc_p.shape
    BT = B * T

    # Per-call layout plumbing on the activation only (weights are pre-padded).
    xf = x.reshape(BT, C).astype(jnp.float32)
    xp = jnp.pad(xf, ((0, 0), (0, Cp - C)))
    p = jnp.asarray(_prefix_mean_matrix(B, T))                # trace-time constant

    flops = 2 * BT * (BT * Cp + Cp * H + H * Cp) + 4 * BT * Cp
    bytes_accessed = 4 * (BT * BT + BT * Cp + Cp * H + (H + 2) * Cp + BT * Cp)

    kernel = functools.partial(bow_block_kernel, hidden=H)
    out_p = pl.pallas_call(
        kernel,
        out_shape=jax.ShapeDtypeStruct((BT, Cp), jnp.float32),
        in_specs=[pl.BlockSpec(memory_space=pltpu.MemorySpace.VMEM)] * 4,
        out_specs=pl.BlockSpec(memory_space=pltpu.MemorySpace.VMEM),
        cost_estimate=pl.CostEstimate(
            flops=flops, transcendentals=BT * H, bytes_accessed=bytes_accessed),
    )(p, xp, wfc_p, wpb)

    return out_p[:, :C].reshape(B, T, C)


def bow_block_ref(x, wfc_t, bfc, wproj_t, bproj):
    """Plain-JAX reference matching the PyTorch forward exactly."""
    B, T, C = x.shape
    mask = jnp.tril(jnp.ones((T, T), jnp.float32))
    att = jnp.where(mask == 0, -jnp.inf, 0.0)
    att = jax.nn.softmax(att, axis=-1)
    y = jnp.einsum("ts,bsc->btc", att, x)
    x1 = x + y
    h = jnp.tanh(x1 @ wfc_t + bfc)
    return x1 + (h @ wproj_t + bproj)


if __name__ == "__main__":
    # config: block_size = T = 8, n_embd = 32, n_embd2 = 64, batch = 2
    B, T, C, H = 2, 8, 32, 64

    key = jax.random.PRNGKey(0)
    kx, k1, k2, k3, k4 = jax.random.split(key, 5)

    x = jax.random.normal(kx, (B, T, C), jnp.float32)

    # Deterministic parameter init (PyTorch Linear-style uniform bounds),
    # stored pre-transposed: (in, out).
    bound_fc = 1.0 / math.sqrt(C)
    bound_pr = 1.0 / math.sqrt(H)
    wfc_t = jax.random.uniform(k1, (C, H), jnp.float32, -bound_fc, bound_fc)
    bfc = jax.random.uniform(k2, (1, H), jnp.float32, -bound_fc, bound_fc)
    wproj_t = jax.random.uniform(k3, (H, C), jnp.float32, -bound_pr, bound_pr)
    bproj = jax.random.uniform(k4, (1, C), jnp.float32, -bound_pr, bound_pr)

    # One-time parameter packing (outside the per-call path).
    wfc_p, wpb = prepare_params(wfc_t, bfc, wproj_t, bproj)
    wfc_p, wpb = jax.block_until_ready((wfc_p, wpb))

    out = bow_block(x, wfc_p, wpb)
    out = jax.block_until_ready(out)

    ref = bow_block_ref(x, wfc_t, bfc, wproj_t, bproj)
    assert out.shape == (B, T, C)
    assert jnp.allclose(out, ref, atol=1e-5, rtol=1e-5), "mismatch vs reference"

    print("KERNEL_OK")
</pallas_src>

<mosaic_0001>
module attributes {stable_mosaic.version = 11 : i64} {
  func.func @bow_block_kernel(%arg0: memref<16x16xf32, #tpu.memory_space<vmem>>, %arg1: memref<16x128xf32, #tpu.memory_space<vmem>>, %arg2: memref<128x64xf32, #tpu.memory_space<vmem>>, %arg3: memref<66x128xf32, #tpu.memory_space<vmem>>, %arg4: memref<16x128xf32, #tpu.memory_space<vmem>>) attributes {dimension_semantics = [], scalar_prefetch = 0 : i64, scratch_operands = 0 : i64, tpu.core_type = #tpu.core_type<tc>} {
    %c0 = arith.constant 0 : index
    %c0_0 = arith.constant 0 : index
    %0 = vector.load %arg1[%c0, %c0_0] : memref<16x128xf32, #tpu.memory_space<vmem>>, vector<16x128xf32>
    %c0_1 = arith.constant 0 : index
    %c0_2 = arith.constant 0 : index
    %1 = vector.load %arg0[%c0_1, %c0_2] : memref<16x16xf32, #tpu.memory_space<vmem>>, vector<16x16xf32>
    %cst = arith.constant dense<0.000000e+00> : vector<16x128xf32>
    %2 = tpu.matmul %1, %0, %cst {dimension_numbers = #tpu.dot_dimension_numbers<[1], [0], [0], [1], [0, 0, 1, 1], [], []>} : vector<16x16xf32>, vector<16x128xf32>, vector<16x128xf32> -> vector<16x128xf32>
    %3 = arith.addf %0, %2 : vector<16x128xf32>
    %c0_3 = arith.constant 0 : index
    %c0_4 = arith.constant 0 : index
    %4 = vector.load %arg3[%c0_3, %c0_4] : memref<66x128xf32, #tpu.memory_space<vmem>>, vector<64x128xf32>
    %c64 = arith.constant 64 : index
    %c0_5 = arith.constant 0 : index
    %5 = vector.load %arg3[%c64, %c0_5] : memref<66x128xf32, #tpu.memory_space<vmem>>, vector<1x64xf32>
    %c65 = arith.constant 65 : index
    %c0_6 = arith.constant 0 : index
    %6 = vector.load %arg3[%c65, %c0_6] : memref<66x128xf32, #tpu.memory_space<vmem>>, vector<1x128xf32>
    %c0_7 = arith.constant 0 : index
    %c0_8 = arith.constant 0 : index
    %7 = vector.load %arg2[%c0_7, %c0_8] : memref<128x64xf32, #tpu.memory_space<vmem>>, vector<128x64xf32>
    %cst_9 = arith.constant dense<0.000000e+00> : vector<16x64xf32>
    %8 = tpu.matmul %3, %7, %cst_9 {dimension_numbers = #tpu.dot_dimension_numbers<[1], [0], [0], [1], [0, 0, 1, 1], [], []>} : vector<16x128xf32>, vector<128x64xf32>, vector<16x64xf32> -> vector<16x64xf32>
    %9 = vector.broadcast %5 : vector<1x64xf32> to vector<16x64xf32>
    %10 = arith.addf %8, %9 : vector<16x64xf32>
    %11 = math.tanh %10 : vector<16x64xf32>
    %cst_10 = arith.constant dense<0.000000e+00> : vector<16x128xf32>
    %12 = tpu.matmul %11, %4, %cst_10 {dimension_numbers = #tpu.dot_dimension_numbers<[1], [0], [0], [1], [0, 0, 1, 1], [], []>} : vector<16x64xf32>, vector<64x128xf32>, vector<16x128xf32> -> vector<16x128xf32>
    %13 = vector.broadcast %6 : vector<1x128xf32> to vector<16x128xf32>
    %14 = arith.addf %12, %13 : vector<16x128xf32>
    %15 = arith.addf %3, %14 : vector<16x128xf32>
    %c0_11 = arith.constant 0 : index
    %c0_12 = arith.constant 0 : index
    %16 = vector.load %arg4[%c0_11, %c0_12] : memref<16x128xf32, #tpu.memory_space<vmem>>, vector<16x128xf32>
    tpu.vector_store %arg4[%c0_11, %c0_12], %15 {strides = array<i32>} : memref<16x128xf32, #tpu.memory_space<vmem>>, vector<16x128xf32>,
    return
  }
}

</mosaic_0001>

<bundles_post_ra>
// kernel: bow_block.1
= control target key start
LH: loop header
LB: loop body
LE: loop exit
PB: predicated region body
PF: predicated region fallthrough
CT: control target
= control target key end

     0   :  { %vm21_vm0 = vcmask 130048   ;;  %vm216_vm1 = vcmask 523264   ;;  %s584_s1 = inlined_call_operand.vmem [shape: f32[16,128], index: 1, kind: input, shape index: {}]   ;;  %s585_s0 = inlined_call_operand.vmem [shape: f32[16,16], index: 0, kind: input, shape index: {}]   ;;  %s586_s2 = inlined_call_operand.vmem [shape: f32[128,64], index: 2, kind: input, shape index: {}]   ;;  %s587_s3 = inlined_call_operand.vmem [shape: f32[66,128], index: 3, kind: input, shape index: {}]   ;;  %s588_s4 = inlined_call_operand.vmem [shape: f32[16,128], index: 4, kind: output, shape index: {}]  }
   0x1   :  { %v17_v0 = vld [vmem:[%s584_s1] sm:$0xff]  ;;  %v18_v1 = vld [vmem:[%s584_s1 + $0x8] sm:$0xff]  ;;  %v117_v7 = vld [vmem:[%s586_s2 + $0x10] sm:$0xff] }
   0x2   :  { %v19_v2 = vld [vmem:[%s585_s0] sm:$0xff]  ;;  %v405_v3 = vpack.c.bf16 %v18_v1, %v17_v0  ;;  %v116_v5 = vld [vmem:[%s586_s2 + $0x8] sm:$0xff]  ;;  %v118_v8 = vld [vmem:[%s586_s2 + $0x18] sm:$0xff] }
   0x3   :  { %348 = vmatprep.mubr.msk.f32.mxu0 %vm21_vm0, %v19_v2  ;;  %v115_v4 = vld [vmem:[%s586_s2] sm:$0xff]  ;;  %v413_v9 = vpack.c.bf16 %v118_v8, %v117_v7  ;;  %v120_v11 = vld [vmem:[%s586_s2 + $0x28] sm:$0xff]  ;;  %v121_v14 = vld [vmem:[%s586_s2 + $0x30] sm:$0xff] }
   0x4   :  { %v409_v6 = vpack.c.bf16 %v116_v5, %v115_v4  ;;  %406 = vmatprep.subr.bf16.mxu0 %v405_v3  ;;  %v119_v10 = vld [vmem:[%s586_s2 + $0x20] sm:$0xff]  ;;  %v20_v12 = vld [vmem:[%s585_s0 + $0x8] sm:$0xff]  ;;  %v122_v15 = vld [vmem:[%s586_s2 + $0x38] sm:$0xff] }
   0x5   :  { %408 = vmatpush3.bf16.msra.mxu0 %v405_v3  ;;  %v417_v13 = vpack.c.bf16 %v120_v11, %v119_v10  ;;  %v421_v16 = vpack.c.bf16 %v122_v15, %v121_v14  ;;  %v123_v17 = vld [vmem:[%s586_s2 + $0x40] sm:$0xff]  ;;  %v124_v18 = vld [vmem:[%s586_s2 + $0x48] sm:$0xff]  ;;  %v125_v20 = vld [vmem:[%s586_s2 + $0x50] sm:$0xff] }
   0x6   :  { %410 = vmatprep.subr.bf16.mxu1 %v409_v6  ;;  %v425_v19 = vpack.c.bf16 %v124_v18, %v123_v17  ;;  %v126_v21 = vld [vmem:[%s586_s2 + $0x58] sm:$0xff]  ;;  %v127_v23 = vld [vmem:[%s586_s2 + $0x60] sm:$0xff]  ;;  %v128_v24 = vld [vmem:[%s586_s2 + $0x68] sm:$0xff] }
   0x7   :  { %412 = vmatpush3.bf16.msra.mxu1 %v409_v6  ;;  %v429_v22 = vpack.c.bf16 %v126_v21, %v125_v20  ;;  %v433_v25 = vpack.c.bf16 %v128_v24, %v127_v23  ;;  %v129_v26 = vld [vmem:[%s586_s2 + $0x70] sm:$0xff]  ;;  %v130_v27 = vld [vmem:[%s586_s2 + $0x78] sm:$0xff]  ;;  %v105_v33 = vld [vmem:[%s587_s3] sm:$0xff] }
   0x8   :  { %414 = vmatprep.subr.bf16.mxu1 %v413_v9  ;;  %349 = vmatmul.mubr.msk.f32.vlgmr.msra.gmra.mrb[0].mxu0 %vm21_vm0, %v20_v12  ;;  %v437_v28 = vpack.c.bf16 %v130_v27, %v129_v26  ;;  %v106_v34 = vld [vmem:[%s587_s3 + $0x8] sm:$0xff]  ;;  %v107_v36 = vld [vmem:[%s587_s3 + $0x10] sm:$0xff]  ;;  %v108_v37 = vld [vmem:[%s587_s3 + $0x18] sm:$0xff] }
   0x9   :  { %v441_v35 = vpack.c.bf16 %v106_v34, %v105_v33  ;;  %v445_v38 = vpack.c.bf16 %v108_v37, %v107_v36  ;;  %v109_v39 = vld [vmem:[%s587_s3 + $0x20] sm:$0xff]  ;;  %v110_v40 = vld [vmem:[%s587_s3 + $0x28] sm:$0xff]  ;;  %v111_v41 = vld [vmem:[%s587_s3 + $0x30] sm:$0xff] }
   0xa   :  { %v449_v42 = vpack.c.bf16 %v110_v40, %v109_v39  ;;  %v112_v43 = vld [vmem:[%s587_s3 + $0x38] sm:$0xff]  ;;  %v308_v45 = vld [vmem:[%s587_s3 + $0x40] ss:$0 sm:$0xff]  ;;  %v309_v52 = vld [vmem:[%s587_s3 + $0x41] ss:$0 sm:$0xff] }
   0xb   :  { %416 = vmatpush3.bf16.msra.mxu1 %v413_v9  ;;  %442 = vmatprep.subr.bf16.mxu0 %v441_v35  ;;  %v453_v44 = vpack.c.bf16 %v112_v43, %v111_v41 }
   0xc   :  { %418 = vmatprep.subr.bf16.mxu1 %v417_v13  ;;  %444 = vmatpush3.bf16.msra.mxu0 %v441_v35 }
   0xd   :  { %446 = vmatprep.subr.bf16.mxu0 %v445_v38 }
   0xf   :  { %420 = vmatpush3.bf16.msra.mxu1 %v417_v13 }
  0x10   :  { %422 = vmatprep.subr.bf16.mxu1 %v421_v16  ;;  %448 = vmatpush3.bf16.msra.mxu0 %v445_v38 }
  0x11   :  { %450 = vmatprep.subr.bf16.mxu0 %v449_v42 }
  0x13   :  { %424 = vmatpush3.bf16.msra.mxu1 %v421_v16 }
  0x14   :  { %426 = vmatprep.subr.bf16.mxu1 %v425_v19  ;;  %452 = vmatpush3.bf16.msra.mxu0 %v449_v42 }
  0x15   :  { %454 = vmatprep.subr.bf16.mxu0 %v453_v44 }
  0x17   :  { %428 = vmatpush3.bf16.msra.mxu1 %v425_v19 }
  0x18   :  { %430 = vmatprep.subr.bf16.mxu1 %v429_v22  ;;  %456 = vmatpush3.bf16.msra.mxu0 %v453_v44 }
  0x1b   :  { %432 = vmatpush3.bf16.msra.mxu1 %v429_v22 }
  0x1c   :  { %434 = vmatprep.subr.bf16.mxu1 %v433_v25 }
  0x1f   :  { %436 = vmatpush3.bf16.msra.mxu1 %v433_v25 }
  0x20   :  { %438 = vmatprep.subr.bf16.mxu1 %v437_v28 }
  0x23   :  { %440 = vmatpush3.bf16.msra.mxu1 %v437_v28 }
  0xdb   :  { %v350_v29 = vpop.f32.mrb[0].mxu0 }
  0xdc   :  { %v94_v30 = vpop.f32.mrb[1].mxu0  ;;  %v104_v32 = vadd.f32 %v350_v29, %v18_v1 }
  0xdd   :  { %v103_v31 = vadd.f32 %v94_v30, %v17_v0 }
  0xdf   :  { %383 = vmatprep.mubr.f32.mxu1 %v103_v31 }
  0xe0   :  { %384 = vmatmul.mubr.f32.vlgmr.msra.gmra.mrb[0].mxu1 %v104_v32 }
 0x1b3   :  { %v385_v46 = vpop.f32.mrb[0].mxu1 }
 0x1b4   :  { %v207_v47 = vadd.f32 %v385_v46, %v308_v45  ;;  %v201_v48 = vpop.f32.mrb[1].mxu1 }
 0x1b5   :  { %v202_v49 = vadd.f32 %v308_v45, %v201_v48 }
 0x1b7   :  { %457 = vtanh.f32 %v202_v49 }
 0x1b8   :  { %459 = vtanh.f32 %v207_v47 }
 0x1c1   :  { %v458_v50 = vpop.eup %457 }
 0x1c2   :  { %v460_v51 = vpop.eup %459  ;;  %402 = vmatprep.mubr.msk.f32.mxu0 %vm216_vm1, %v458_v50 }
 0x1c3   :  { %403 = vmatmul.mubr.msk.f32.vlgmr.msra.gmra.mrb[2].mxu0 %vm216_vm1, %v460_v51 }
 0x296   :  { %v404_v53 = vpop.f32.mrb[2].mxu0 }
 0x297   :  { %v295_v54 = vadd.f32 %v404_v53, %v309_v52  ;;  %v289_v55 = vpop.f32.mrb[3].mxu0 }
 0x298   :  { %v290_v56 = vadd.f32 %v309_v52, %v289_v55 }
 0x299   :  { %v299_v57 = vadd.f32 %v295_v54, %v104_v32 }
 0x29a   :  { %v298_v58 = vadd.f32 %v290_v56, %v103_v31 }
 0x29b   :  { %301 = vst [vmem:[%s588_s4 + $0x8] sm:$0xff] %v299_v57 }
 0x29c   :  { %300 = vst [vmem:[%s588_s4] sm:$0xff] %v298_v58 }

</bundles_post_ra>
